<compile_context>
chip_gen: v7x
topology: tpu7x:2x2x1
jax: 0.10.0
libtpu: 0.0.40
codegen_flags: <defaults>
</compile_context>

<pallas_src>
import jax
import jax.numpy as jnp
from jax.experimental import pallas as pl
from jax.experimental.pallas import tpu as pltpu

HIDDEN = 128  # module's self.hidden


def critic_kernel(x_ref, w1_ref, b1_ref, w2_ref, b2_ref, w3_ref, b3_ref, o_ref):
    # Layer 1: Linear(input_dims -> 2*hidden) + ReLU.  bf16 MXU inputs, f32 accumulation.
    h1 = jnp.dot(x_ref[...], w1_ref[...], preferred_element_type=jnp.float32)
    h1 = jnp.maximum(h1 + b1_ref[...], 0.0)          # f32 VPU epilogue
    # Layer 2: Linear(2*hidden -> hidden) + ReLU.  Cast activations to bf16 for the MXU.
    h2 = jnp.dot(h1.astype(jnp.bfloat16), w2_ref[...],
                 preferred_element_type=jnp.float32)
    h2 = jnp.maximum(h2 + b2_ref[...], 0.0)          # f32 VPU epilogue
    # Layer 3: Linear(hidden -> 1) as VPU multiply + lane reduction (avoids a 128->1 MXU pass).
    out = jnp.sum(h2 * w3_ref[...], axis=-1, keepdims=True) + b3_ref[0]
    o_ref[...] = out.astype(o_ref.dtype)


def critic_forward(x, params, *, block_b=512):
    w1, b1, w2, b2, w3, b3 = params
    B, D = x.shape
    tb = min(block_b, B)
    grid = (pl.cdiv(B, tb),)

    # bf16 MXU operands (halves weight/activation DMA bytes); biases & w3 stay f32.
    x_bf = x.astype(jnp.bfloat16)
    w1_bf = w1.astype(jnp.bfloat16)
    w2_bf = w2.astype(jnp.bfloat16)

    # Constant index_map -> block revisited every step -> stays resident in VMEM.
    resident = lambda a: pl.BlockSpec(a.shape, lambda i: (0,) * a.ndim)

    return pl.pallas_call(
        critic_kernel,
        out_shape=jax.ShapeDtypeStruct((B, 1), jnp.float32),
        grid=grid,
        in_specs=[
            pl.BlockSpec((tb, D), lambda i: (i, 0)),              # x: tiled over batch
            resident(w1_bf), resident(b1),
            resident(w2_bf), resident(b2),
            resident(w3),
            pl.BlockSpec(memory_space=pltpu.MemorySpace.SMEM),    # b3: scalar in SMEM
        ],
        out_specs=pl.BlockSpec((tb, 1), lambda i: (i, 0)),
        compiler_params=pltpu.CompilerParams(
            dimension_semantics=("parallel",)),                   # megacore on v7x
    )(x_bf, w1_bf, b1, w2_bf, b2, w3, b3)


def init_params(key, input_dims):
    # Deterministic PyTorch-style init: U(-1/sqrt(fan_in), 1/sqrt(fan_in)).
    def linear(key, fan_in, fan_out):
        kw, kb = jax.random.split(key)
        bound = 1.0 / jnp.sqrt(fan_in)
        w = jax.random.uniform(kw, (fan_in, fan_out), jnp.float32, -bound, bound)
        b = jax.random.uniform(kb, (1, fan_out), jnp.float32, -bound, bound)
        return w, b

    k1, k2, k3 = jax.random.split(key, 3)
    w1, b1 = linear(k1, input_dims, 2 * HIDDEN)
    w2, b2 = linear(k2, 2 * HIDDEN, HIDDEN)
    w3_t, b3_row = linear(k3, HIDDEN, 1)
    w3 = w3_t.T                     # stored (1, hidden), PyTorch storage order
    b3 = b3_row.reshape((1,))       # scalar bias, shipped via SMEM
    return (w1, b1, w2, b2, w3, b3)


def reference_forward_bf16(x, params):
    # Reference with the same bf16 operand quantization / f32 accumulation as the kernel.
    w1, b1, w2, b2, w3, b3 = params
    xb, w1b, w2b = (a.astype(jnp.bfloat16) for a in (x, w1, w2))
    h1 = jnp.maximum(jnp.dot(xb, w1b, preferred_element_type=jnp.float32) + b1, 0.0)
    h2 = jnp.maximum(jnp.dot(h1.astype(jnp.bfloat16), w2b,
                             preferred_element_type=jnp.float32) + b2, 0.0)
    return jnp.sum(h2 * w3, axis=-1, keepdims=True) + b3


def reference_forward_f32(x, params):
    w1, b1, w2, b2, w3, b3 = params
    h1 = jnp.maximum(x @ w1 + b1, 0.0)
    h2 = jnp.maximum(h1 @ w2 + b2, 0.0)
    return jnp.sum(h2 * w3, axis=-1, keepdims=True) + b3


if __name__ == "__main__":
    key = jax.random.PRNGKey(0)
    kx, kp, kx2 = jax.random.split(key, 3)

    input_dims = 32
    params = init_params(kp, input_dims)

    # Small batch (single grid step), matches the toy module usage.
    x_small = jax.random.normal(kx, (8, input_dims), jnp.float32)
    out_small = jax.block_until_ready(critic_forward(x_small, params))
    assert out_small.shape == (8, 1)
    assert jnp.allclose(out_small, reference_forward_bf16(x_small, params),
                        atol=2e-3, rtol=2e-3)
    assert jnp.allclose(out_small, reference_forward_f32(x_small, params),
                        atol=5e-2, rtol=5e-2)

    # Larger batch exercising the batch grid (2 tiles of 128) + weight residency.
    x_big = jax.random.normal(kx2, (256, input_dims), jnp.float32)
    out_big = jax.block_until_ready(critic_forward(x_big, params, block_b=128))
    assert out_big.shape == (256, 1)
    assert jnp.allclose(out_big, reference_forward_bf16(x_big, params),
                        atol=2e-3, rtol=2e-3)
    assert jnp.allclose(out_big, reference_forward_f32(x_big, params),
                        atol=5e-2, rtol=5e-2)

    print("KERNEL_OK")
</pallas_src>

<mosaic_0001>
module attributes {stable_mosaic.version = 11 : i64} {
  func.func @critic_kernel(%arg0: i32, %arg1: memref<8x32xbf16, #tpu.memory_space<vmem>>, %arg2: memref<32x256xbf16, #tpu.memory_space<vmem>>, %arg3: memref<1x256xf32, #tpu.memory_space<vmem>>, %arg4: memref<256x128xbf16, #tpu.memory_space<vmem>>, %arg5: memref<1x128xf32, #tpu.memory_space<vmem>>, %arg6: memref<1x128xf32, #tpu.memory_space<vmem>>, %arg7: memref<1xf32, #tpu.memory_space<smem>>, %arg8: memref<8x1xf32, #tpu.memory_space<vmem>>) attributes {dimension_semantics = [#tpu.dimension_semantics<parallel>], iteration_bounds = array<i64: 1>, scalar_prefetch = 0 : i64, scratch_operands = 0 : i64, tpu.core_type = #tpu.core_type<tc>, window_params = [{transform_indices = @transform_0, window_bounds = array<i64: 8, 32>}, {pipeline_mode = #tpu.pipeline_mode<synchronous>, transform_indices = @transform_1, window_bounds = array<i64: 32, 256>}, {pipeline_mode = #tpu.pipeline_mode<synchronous>, transform_indices = @transform_2, window_bounds = array<i64: 1, 256>}, {pipeline_mode = #tpu.pipeline_mode<synchronous>, transform_indices = @transform_3, window_bounds = array<i64: 256, 128>}, {pipeline_mode = #tpu.pipeline_mode<synchronous>, transform_indices = @transform_4, window_bounds = array<i64: 1, 128>}, {pipeline_mode = #tpu.pipeline_mode<synchronous>, transform_indices = @transform_5, window_bounds = array<i64: 1, 128>}, {transform_indices = @transform_6, window_bounds = array<i64: 1>}, {transform_indices = @transform_7, window_bounds = array<i64: 8, 1>}]} {
    %c0 = arith.constant 0 : index
    %c0_0 = arith.constant 0 : index
    %0 = vector.load %arg1[%c0, %c0_0] : memref<8x32xbf16, #tpu.memory_space<vmem>>, vector<8x32xbf16>
    %c0_1 = arith.constant 0 : index
    %c0_2 = arith.constant 0 : index
    %1 = vector.load %arg2[%c0_1, %c0_2] : memref<32x256xbf16, #tpu.memory_space<vmem>>, vector<32x256xbf16>
    %cst = arith.constant dense<0.000000e+00> : vector<8x256xf32>
    %2 = tpu.matmul %0, %1, %cst {dimension_numbers = #tpu.dot_dimension_numbers<[1], [0], [0], [1], [0, 0, 1, 1], [], []>} : vector<8x32xbf16>, vector<32x256xbf16>, vector<8x256xf32> -> vector<8x256xf32>
    %c0_3 = arith.constant 0 : index
    %c0_4 = arith.constant 0 : index
    %3 = vector.load %arg3[%c0_3, %c0_4] : memref<1x256xf32, #tpu.memory_space<vmem>>, vector<1x256xf32>
    %4 = vector.broadcast %3 : vector<1x256xf32> to vector<8x256xf32>
    %5 = arith.addf %2, %4 : vector<8x256xf32>
    %cst_5 = arith.constant 0.000000e+00 : f32
    %6 = vector.broadcast %cst_5 : f32 to vector<8x256xf32>
    %7 = arith.maximumf %5, %6 : vector<8x256xf32>
    %8 = arith.truncf %7 : vector<8x256xf32> to vector<8x256xbf16>
    %c0_6 = arith.constant 0 : index
    %c0_7 = arith.constant 0 : index
    %9 = vector.load %arg4[%c0_6, %c0_7] : memref<256x128xbf16, #tpu.memory_space<vmem>>, vector<256x128xbf16>
    %cst_8 = arith.constant dense<0.000000e+00> : vector<8x128xf32>
    %10 = tpu.matmul %8, %9, %cst_8 {dimension_numbers = #tpu.dot_dimension_numbers<[1], [0], [0], [1], [0, 0, 1, 1], [], []>} : vector<8x256xbf16>, vector<256x128xbf16>, vector<8x128xf32> -> vector<8x128xf32>
    %c0_9 = arith.constant 0 : index
    %c0_10 = arith.constant 0 : index
    %11 = vector.load %arg5[%c0_9, %c0_10] : memref<1x128xf32, #tpu.memory_space<vmem>>, vector<1x128xf32>
    %12 = vector.broadcast %11 : vector<1x128xf32> to vector<8x128xf32>
    %13 = arith.addf %10, %12 : vector<8x128xf32>
    %cst_11 = arith.constant 0.000000e+00 : f32
    %14 = vector.broadcast %cst_11 : f32 to vector<8x128xf32>
    %15 = arith.maximumf %13, %14 : vector<8x128xf32>
    %c0_12 = arith.constant 0 : index
    %c0_13 = arith.constant 0 : index
    %16 = vector.load %arg6[%c0_12, %c0_13] : memref<1x128xf32, #tpu.memory_space<vmem>>, vector<1x128xf32>
    %17 = vector.broadcast %16 : vector<1x128xf32> to vector<8x128xf32>
    %18 = arith.mulf %15, %17 : vector<8x128xf32>
    %cst_14 = arith.constant dense<0.000000e+00> : vector<8xf32>
    %19 = vector.multi_reduction <add>, %18, %cst_14 [1] : vector<8x128xf32> to vector<8xf32>
    %20 = vector.shape_cast %19 : vector<8xf32> to vector<8x1xf32>
    %c0_15 = arith.constant 0 : index
    %21 = memref.load %arg7[%c0_15] : memref<1xf32, #tpu.memory_space<smem>>
    %22 = vector.broadcast %21 : f32 to vector<8x1xf32>
    %23 = arith.addf %20, %22 : vector<8x1xf32>
    %c0_16 = arith.constant 0 : index
    %c0_17 = arith.constant 0 : index
    %24 = vector.load %arg8[%c0_16, %c0_17] : memref<8x1xf32, #tpu.memory_space<vmem>>, vector<8x1xf32>
    tpu.vector_store %arg8[%c0_16, %c0_17], %23 {strides = array<i32>} : memref<8x1xf32, #tpu.memory_space<vmem>>, vector<8x1xf32>,
    return
  }
  func.func @transform_0(%arg0: i32) -> (i32, i32) {
    %c0_i32 = arith.constant 0 : i32
    %c0_i32_0 = arith.constant 0 : i32
    return %arg0, %c0_i32 : i32, i32
  }
  func.func @transform_1(%arg0: i32) -> (i32, i32) {
    %c0_i32 = arith.constant 0 : i32
    %c0_i32_0 = arith.constant 0 : i32
    %c0_i32_1 = arith.constant 0 : i32
    return %c0_i32, %c0_i32_0 : i32, i32
  }
  func.func @transform_2(%arg0: i32) -> (i32, i32) {
    %c0_i32 = arith.constant 0 : i32
    %c0_i32_0 = arith.constant 0 : i32
    %c0_i32_1 = arith.constant 0 : i32
    return %c0_i32, %c0_i32_0 : i32, i32
  }
  func.func @transform_3(%arg0: i32) -> (i32, i32) {
    %c0_i32 = arith.constant 0 : i32
    %c0_i32_0 = arith.constant 0 : i32
    %c0_i32_1 = arith.constant 0 : i32
    return %c0_i32, %c0_i32_0 : i32, i32
  }
  func.func @transform_4(%arg0: i32) -> (i32, i32) {
    %c0_i32 = arith.constant 0 : i32
    %c0_i32_0 = arith.constant 0 : i32
    %c0_i32_1 = arith.constant 0 : i32
    return %c0_i32, %c0_i32_0 : i32, i32
  }
  func.func @transform_5(%arg0: i32) -> (i32, i32) {
    %c0_i32 = arith.constant 0 : i32
    %c0_i32_0 = arith.constant 0 : i32
    %c0_i32_1 = arith.constant 0 : i32
    return %c0_i32, %c0_i32_0 : i32, i32
  }
  func.func @transform_6(%arg0: i32) -> i32 {
    %c0_i32 = arith.constant 0 : i32
    %c0_i32_0 = arith.constant 0 : i32
    return %c0_i32 : i32
  }
  func.func @transform_7(%arg0: i32) -> (i32, i32) {
    %c0_i32 = arith.constant 0 : i32
    %c0_i32_0 = arith.constant 0 : i32
    return %arg0, %c0_i32 : i32, i32
  }
}

</mosaic_0001>

<bundles_post_ra>
// kernel: tpu_custom_call.1
= control target key start
LH: loop header
LB: loop body
LE: loop exit
PB: predicated region body
PF: predicated region fallthrough
CT: control target
= control target key end

     0   :  { %13 = vsyncpa [#allocation4], 0  ;;  %s594_s0 = inlined_call_operand.hbm [shape: bf16[8,32], index: 0, kind: input, shape index: {}]   ;;  %s595_s1 = inlined_call_operand.hbm [shape: bf16[32,256], index: 1, kind: input, shape index: {}]   ;;  %s596_s2 = inlined_call_operand.vmem [shape: f32[1,256], index: 2, kind: input, shape index: {}]   ;;  %s597_s3 = inlined_call_operand.hbm [shape: bf16[256,128], index: 3, kind: input, shape index: {}]   ;;  %s598_s4 = inlined_call_operand.vmem [shape: f32[1,128], index: 4, kind: input, shape index: {}]   ;;  %s599_s5 = inlined_call_operand.vmem [shape: f32[1,128], index: 5, kind: input, shape index: {}]   ;;  %s600_s6 = inlined_call_operand.<no memory space> [shape: f32[1], index: 6, kind: input, shape index: {}]   ;;  %s601_s7 = inlined_call_operand.vmem [shape: f32[8,1], index: 7, kind: output, shape index: {}]  }
   0x1   :  { %14 = vsyncpa [#allocation6], 0  ;;  %s495_s24 = smov [#allocation5]   ;;  %s425_s28 = scalar_lea.hbm %s595_s1, 512 }
   0x2   :  { %s30_s25 = sshll.u32 %s495_s24, 4  ;;  %p426_p0 = scmp.ne.s32.totalorder %s595_s1, %s425_s28  ;;  %s31_s25 = int_to_ptr.vmem [resolvable:$true] %s30_s25 }
   0x3   :  { %p429_p1 = scmp.lt.u32.totalorder %s425_s28, %s595_s1 }
   0x5   :  { %p431_p2 = pnand %p429_p1, %p426_p0 }
   0x7   :  { %434 = shalt.err (!%p431_p2)
}
   0x8   :  { %s435_s10 = scalar_lea.vmem %s31_s25, 512  ;;  %p440_p4 = scmp.lt.s32.totalorder %s31_s25, %s31_s25 }
   0x9   :  { %p436_p3 = scmp.ne.s32.totalorder %s31_s25, %s435_s10  ;;  %p441_p5 = scmp.lt.s32.totalorder %s435_s10, %s435_s10 }
   0xb   :  { %p442_p6 = por %p441_p5, %p440_p4 }
   0xd   :  { %p443_p7 = pnand %p442_p6, %p436_p3 }
   0xf   :  { %446 = shalt.err (!%p443_p7)
}
  0x10   :  { %s496_s11 = smov 128   ;;  %s497_s12 = smov 8  }
  0x11   :  { %36 = dma.hbm_to_vmem [thread:$0]  %s595_s1, 512, %s31_s25, [#allocation6], %s496_s11, %s496_s11, %s497_s12  }
  0x12   :  { %s498_s15 = smov [#allocation3]   ;;  %s499_s17 = smov [#allocation7]  }
  0x13   :  { %s21_s16 = sshll.u32 %s498_s15, 4  ;;  %s44_s18 = sshll.u32 %s499_s17, 4  ;;  %s22_s16 = int_to_ptr.vmem [resolvable:$true] %s21_s16  ;;  %s45_s18 = int_to_ptr.vmem [resolvable:$true] %s44_s18 }
  0x14   :  { %s447_s21 = scalar_lea.hbm %s594_s0, 64 }
  0x15   :  { %p448_p8 = scmp.ne.s32.totalorder %s594_s0, %s447_s21  ;;  %p451_p9 = scmp.lt.u32.totalorder %s447_s21, %s594_s0 }
  0x17   :  { %p453_p10 = pnand %p451_p9, %p448_p8 }
  0x19   :  { %456 = shalt.err (!%p453_p10)
}
  0x1a   :  { %s457_s1 = scalar_lea.vmem %s22_s16, 64  ;;  %p462_p12 = scmp.lt.s32.totalorder %s22_s16, %s22_s16 }
  0x1b   :  { %p458_p11 = scmp.ne.s32.totalorder %s22_s16, %s457_s1  ;;  %p463_p13 = scmp.lt.s32.totalorder %s457_s1, %s457_s1 }
  0x1d   :  { %p464_p0 = por %p463_p13, %p462_p12 }
  0x1f   :  { %p465_p1 = pnand %p464_p0, %p458_p11 }
  0x21   :  { %468 = shalt.err (!%p465_p1)
}
  0x22   :  { %24 = dma.hbm_to_vmem [thread:$0]  %s594_s0, 64, %s22_s16, [#allocation4]  }
  0x23   :  { %s469_s30 = scalar_lea.hbm %s597_s3, 2048 }
  0x24   :  { %p470_p2 = scmp.ne.s32.totalorder %s597_s3, %s469_s30  ;;  %p473_p3 = scmp.lt.u32.totalorder %s469_s30, %s597_s3 }
  0x26   :  { %p475_p4 = pnand %p473_p3, %p470_p2 }
  0x28   :  { %478 = shalt.err (!%p475_p4)
}
  0x29   :  { %s479_s12 = scalar_lea.vmem %s45_s18, 2048  ;;  %p484_p6 = scmp.lt.s32.totalorder %s45_s18, %s45_s18 }
  0x2a   :  { %p480_p5 = scmp.ne.s32.totalorder %s45_s18, %s479_s12  ;;  %p485_p7 = scmp.lt.s32.totalorder %s479_s12, %s479_s12 }
  0x2c   :  { %p486_p8 = por %p485_p7, %p484_p6 }
  0x2e   :  { %p487_p9 = pnand %p486_p8, %p480_p5 }
  0x30   :  { %490 = shalt.err (!%p487_p9)
}
  0x31   :  { %s500_s0 = smov 64   ;;  %s501_s13 = smov 4  }
  0x32   :  { %50 = dma.hbm_to_vmem [thread:$0]  %s597_s3, 2048, %s45_s18, [#allocation6], %s500_s0, %s500_s0, %s501_s13  }
  0x33   :  { %491 = dma.done.wait [#allocation4], 64  }
  0x34   :  { %492 = vsyncadd [#allocation4], 4294967232 }
  0x35   :  { %493 = dma.done.wait [#allocation6], 2560  }
  0x36   :  { %494 = vsyncadd [#allocation6], 4294964736  ;;  %v502_v0 = vmov 0   ;;  %v403_v1 = vld [vmem:[#allocation5 + $0x4] ss:$8 sps:$4 sm:$0xff]   ;;  %vm104_vm0 = vcmask 261120   ;;  %v74_v22 = vlaneseq  ;;  %v340_v49 = vstv %s600_s6 }
  0x37   :  { %140 = vmatprep.mubr.bf16.mxu0 %v502_v0  ;;  %v405_v2 = vld [vmem:[#allocation5] ss:$8 sps:$4 sm:$0xff]   ;;  %108 = vmatprep.subr.bf16.mxu0 %v403_v1  ;;  %v406_v3 = vld [vmem:[#allocation5 + $0x14] ss:$8 sps:$4 sm:$0xff]   ;;  %v408_v4 = vld [vmem:[#allocation5 + $0x10] ss:$8 sps:$4 sm:$0xff]  }
  0x38   :  { %109 = vmatpush1.bf16.msra.mxu0 %v405_v2  ;;  %v409_v5 = vld [vmem:[#allocation7 + $0x40] sm:$0xff]   ;;  %v67_v7 = vld [vmem:[#allocation3] sm:$0xf]  ;;  %v411_v8 = vld [vmem:[#allocation7 + $0x48] sm:$0xff]   ;;  %v75_v23 = vshrl.u32 %v74_v22, 7  ;;  %vm342_vm1 = vcmask 7168  }
  0x39   :  { %110 = vmatprep.subr.bf16.mxu0 %v406_v3  ;;  %v410_v6 = vld [vmem:[#allocation7] sm:$0xff]   ;;  %373 = vmatprep.subr.bf16.mxu1 %v409_v5  ;;  %v412_v9 = vld [vmem:[#allocation7 + $0x8] sm:$0xff]   ;;  %v413_v10 = vld [vmem:[#allocation7 + $0x50] sm:$0xff]  }
  0x3a   :  { %374 = vmatpush3.bf16.msra.mxu1 %v410_v6  ;;  %v414_v11 = vld [vmem:[#allocation7 + $0x10] sm:$0xff]   ;;  %v415_v12 = vld [vmem:[#allocation7 + $0x58] sm:$0xff]   ;;  %v417_v14 = vld [vmem:[#allocation7 + $0x60] sm:$0xff]   ;;  %v76_v24 = vsub.s32 0, %v75_v23  ;;  %v80_v26 = vsub.s32 1, %v75_v23 }
  0x3b   :  { %375 = vmatprep.subr.bf16.mxu1 %v411_v8  ;;  %v416_v13 = vld [vmem:[#allocation7 + $0x18] sm:$0xff]   ;;  %v418_v15 = vld [vmem:[#allocation7 + $0x20] sm:$0xff]   ;;  %v419_v16 = vld [vmem:[#allocation7 + $0x68] sm:$0xff]  }
  0x3c   :  { %111 = vmatpush1.bf16.msra.mxu0 %v408_v4  ;;  %v420_v17 = vld [vmem:[#allocation7 + $0x28] sm:$0xff]   ;;  %v421_v18 = vld [vmem:[#allocation7 + $0x70] sm:$0xff]   ;;  %v423_v20 = vld [vmem:[#allocation7 + $0x78] sm:$0xff]  }
  0x3d   :  { %v422_v19 = vld [vmem:[#allocation7 + $0x30] sm:$0xff]   ;;  %v424_v21 = vld [vmem:[#allocation7 + $0x38] sm:$0xff]  }
  0x3e   :  { %376 = vmatpush3.bf16.msra.mxu1 %v412_v9  ;;  %v72_v25 = vld [vmem:[%s596_s2] sm:$0x3] }
  0x3f   :  { %354 = vmatmul.mubr.msk.bf16.vlgmr.msra.gmra.mrb[0].mxu0 %vm104_vm0, %v67_v7  ;;  %377 = vmatprep.subr.bf16.mxu1 %v413_v10  ;;  %v77_v27 = vrot.slane %v72_v25, %v76_v24  ;;  %v81_v28 = vrot.slane %v72_v25, %v80_v26  ;;  %v355_v41 = vld [vmem:[%s598_s4] ss:$0 sm:$0xff] }
  0x40   :  { %v372_v46 = vld [vmem:[%s599_s5] ss:$0 sm:$0xff] }
  0x42   :  { %378 = vmatpush3.bf16.msra.mxu1 %v414_v11 }
  0x43   :  { %379 = vmatprep.subr.bf16.mxu1 %v415_v12 }
  0x46   :  { %380 = vmatpush3.bf16.msra.mxu1 %v416_v13 }
  0x47   :  { %381 = vmatprep.subr.bf16.mxu1 %v417_v14 }
  0x4a   :  { %382 = vmatpush3.bf16.msra.mxu1 %v418_v15 }
  0x4b   :  { %383 = vmatprep.subr.bf16.mxu1 %v419_v16 }
  0x4e   :  { %384 = vmatpush3.bf16.msra.mxu1 %v420_v17 }
  0x4f   :  { %385 = vmatprep.subr.bf16.mxu1 %v421_v18 }
  0x52   :  { %386 = vmatpush3.bf16.msra.mxu1 %v422_v19 }
  0x53   :  { %387 = vmatprep.subr.bf16.mxu1 %v423_v20 }
  0x56   :  { %388 = vmatpush3.bf16.msra.mxu1 %v424_v21 }
 0x112   :  { %v142_v29 = vpop.f32.mrb[0].mxu0 }
 0x113   :  { %v143_v30 = vadd.f32 %v142_v29, %v77_v27  ;;  %v144_v31 = vpop.f32.mrb[1].mxu0 }
 0x114   :  { %v145_v32 = vadd.f32 %v144_v31, %v81_v28  ;;  %v146_v33 = vpop.f32.mrb[2].mxu0 }
 0x115   :  { %v149_v34 = vmax.f32 %v143_v30, 0.0  ;;  %v147_v35 = vpop.f32.mrb[3].mxu0 }
 0x116   :  { %v150_v36 = vmax.f32 %v145_v32, 0.0 }
 0x117   :  { %v151_v38 = vpack.c.bf16 %v149_v34, %v149_v34 }
 0x118   :  { %v152_v37 = vpack.c.bf16 %v150_v36, %v150_v36 }
 0x11a   :  { %320 = vmatprep.mubr.bf16.mxu1 %v152_v37 }
 0x11b   :  { %321 = vmatmul.mubr.bf16.vlgmr.msra.gmra.mrb[0].mxu1 %v151_v38 }
 0x1ee   :  { %v389_v39 = vpop.f32.mrb[0].mxu1 }
 0x1ef   :  { %v390_v40 = vpop.f32.mrb[1].mxu1 }
 0x1f0   :  { %v391_v42 = vadd.f32 %v390_v40, %v389_v39  ;;  %v392_v43 = vpop.f32.mrb[2].mxu1 }
 0x1f1   :  { %v393_v44 = vpop.f32.mrb[3].mxu1 }
 0x1f2   :  { %v323_v45 = vadd.f32 %v391_v42, %v355_v41 }
 0x1f4   :  { %v328_v47 = vmax.f32 %v323_v45, 0.0 }
 0x1f6   :  { %v336_v48 = vmul.f32 %v372_v46, %v328_v47 }
 0x1f8   :  { %337 = vadd.xlane.f32.xlu0 %v336_v48 }
 0x285   :  { %v338_v50 = vpop.xlane.xlu0 %337 }
 0x286   :  { %v341_v51 = vadd.f32 %v340_v49, %v338_v50 }
 0x288   :  { %343 = vst.msk [vmem:[%s601_s7] sm:$0xff] %vm342_vm1, %v341_v51 }
 0x289   :  { %348 = vsyncpa [#allocation4], 1 }
 0x28a   :  { %349 = vsyncpa [#allocation6], 1 }

</bundles_post_ra>
